<compile_context>
chip_gen: v6e
topology: v6e:2x2x1
jax: 0.10.0
libtpu: 0.0.40
codegen_flags: <defaults>
</compile_context>

<pallas_src>
import jax
import jax.numpy as jnp
from jax.experimental import pallas as pl
from jax.experimental.pallas import tpu as pltpu

LANE = 128      # TPU lane width: pad every feature (last) dim to this
TILE_B = 16     # batch tile (multiple of 16 => bf16-sublane aligned)


# ----------------------------------------------------------------------------
# Pallas kernel: fused 2-layer MLP producing both the intermediate ("hidden")
# and final ("logits") activations — the two entries of the inner model's dict.
# Operands arrive bf16 (MXU-native), accumulation and elementwise are f32.
# ----------------------------------------------------------------------------
def _mlp_kernel(x_ref, w1_ref, b1_ref, w2_ref, b2_ref, hidden_ref, logits_ref):
    x = x_ref[...]                                   # (TILE_B, D_IN_P)  bf16
    # Layer 1: x @ W1 (MXU, bf16 operands, f32 accumulate), bias + ReLU in f32.
    h = jnp.dot(x, w1_ref[...], preferred_element_type=jnp.float32)
    h = jnp.maximum(h + b1_ref[...], 0.0)            # f32
    hidden_ref[...] = h.astype(hidden_ref.dtype)     # lane-dense (TILE_B,128) store
    # Layer 2: cast hidden to bf16 for the MXU, accumulate f32, bias in f32.
    y = jnp.dot(h.astype(jnp.bfloat16), w2_ref[...],
                preferred_element_type=jnp.float32)
    logits_ref[...] = (y + b2_ref[...]).astype(logits_ref.dtype)


def _round_up(n, m):
    return ((n + m - 1) // m) * m


def _pad2d(a, rows, cols):
    r, c = a.shape
    return jnp.pad(a, ((0, rows - r), (0, cols - c)))


def _mlp_pallas(x, w1, b1, w2, b2):
    B, D_in = x.shape
    D_hid = w1.shape[1]
    D_out = w2.shape[1]

    # Pad feature dims to 128 lanes, batch to a multiple of TILE_B; zero pad
    # keeps the valid slice of the result identical to the unpadded compute.
    D_in_p = _round_up(D_in, LANE)
    D_hid_p = _round_up(D_hid, LANE)
    D_out_p = _round_up(D_out, LANE)
    B_p = _round_up(B, TILE_B)

    x_p = _pad2d(x, B_p, D_in_p).astype(jnp.bfloat16)
    w1_p = _pad2d(w1, D_in_p, D_hid_p).astype(jnp.bfloat16)
    w2_p = _pad2d(w2, D_hid_p, D_out_p).astype(jnp.bfloat16)
    b1_p = _pad2d(b1, 1, D_hid_p).astype(jnp.float32)
    b2_p = _pad2d(b2, 1, D_out_p).astype(jnp.float32)

    grid = (B_p // TILE_B,)

    hidden_p, logits_p = pl.pallas_call(
        _mlp_kernel,
        out_shape=(
            jax.ShapeDtypeStruct((B_p, D_hid_p), jnp.float32),
            jax.ShapeDtypeStruct((B_p, D_out_p), jnp.float32),
        ),
        grid=grid,
        in_specs=[
            # Activations: tiled over batch (double-buffered by Pallas).
            pl.BlockSpec((TILE_B, D_in_p), lambda i: (i, 0)),
            # Weights / biases: block 0 every step -> stay VMEM-resident.
            pl.BlockSpec((D_in_p, D_hid_p), lambda i: (0, 0)),
            pl.BlockSpec((1, D_hid_p), lambda i: (0, 0)),
            pl.BlockSpec((D_hid_p, D_out_p), lambda i: (0, 0)),
            pl.BlockSpec((1, D_out_p), lambda i: (0, 0)),
        ],
        out_specs=(
            pl.BlockSpec((TILE_B, D_hid_p), lambda i: (i, 0)),
            pl.BlockSpec((TILE_B, D_out_p), lambda i: (i, 0)),
        ),
        compiler_params=pltpu.CompilerParams(
            dimension_semantics=("parallel",),   # megacore split on v7x
        ),
    )(x_p, w1_p, b1_p, w2_p, b2_p)

    # Slice back to logical (unpadded) shapes outside the kernel.
    return hidden_p[:B, :D_hid], logits_p[:B, :D_out]


# ----------------------------------------------------------------------------
# Synthetic inner model (stands in for the arbitrary `self.model`), returns a
# dict so the wrapper's dict-flattening branch is exercised.
# ----------------------------------------------------------------------------
class SyntheticInnerModel:
    def __init__(self, key, d_in, d_hid, d_out):
        k1, k2, k3, k4 = jax.random.split(key, 4)
        self.w1 = jax.random.normal(k1, (d_in, d_hid), jnp.float32) * 0.05
        self.b1 = jax.random.normal(k2, (1, d_hid), jnp.float32) * 0.05
        self.w2 = jax.random.normal(k3, (d_hid, d_out), jnp.float32) * 0.05
        self.b2 = jax.random.normal(k4, (1, d_out), jnp.float32) * 0.05

    def __call__(self, x):
        hidden, logits = _mlp_pallas(x, self.w1, self.b1, self.w2, self.b2)
        return {"hidden": hidden, "logits": logits}


# ----------------------------------------------------------------------------
# TraceModelWrapper semantics (exact port of the PyTorch forward).
# ----------------------------------------------------------------------------
class TraceModelWrapper:
    def __init__(self, model):
        self.model = model

    def forward(self, *input_data, **input_dict):
        out = self.model(*input_data, **input_dict)
        if isinstance(out, dict):
            return list(out.values())
        return out

    __call__ = forward


if __name__ == "__main__":
    B, D_IN, D_HID, D_OUT = 32, 32, 64, 32

    key = jax.random.PRNGKey(0)
    k_x, k_params = jax.random.split(key)
    x = jax.random.normal(k_x, (B, D_IN), jnp.float32)

    inner = SyntheticInnerModel(k_params, D_IN, D_HID, D_OUT)
    wrapper = TraceModelWrapper(inner)

    outputs = wrapper(x)  # dict output -> flattened to a list of values
    assert isinstance(outputs, list) and len(outputs) == 2
    outputs = jax.block_until_ready(outputs)

    # Reference in plain JAX, with the same bf16 operand quantization the
    # kernel applies (accumulation / elementwise in f32).
    q = lambda a: a.astype(jnp.bfloat16).astype(jnp.float32)
    h_ref = jnp.maximum(q(x) @ q(inner.w1) + inner.b1, 0.0)
    y_ref = q(h_ref) @ q(inner.w2) + inner.b2

    assert outputs[0].shape == (B, D_HID) and outputs[1].shape == (B, D_OUT)
    assert jnp.allclose(outputs[0], h_ref, atol=2e-3, rtol=2e-3)
    assert jnp.allclose(outputs[1], y_ref, atol=2e-3, rtol=2e-3)

    print("KERNEL_OK")
</pallas_src>

<mosaic_0001>
module attributes {stable_mosaic.version = 11 : i64} {
  func.func @_mlp_kernel(%arg0: i32, %arg1: memref<16x128xbf16, #tpu.memory_space<vmem>>, %arg2: memref<128x128xbf16, #tpu.memory_space<vmem>>, %arg3: memref<1x128xf32, #tpu.memory_space<vmem>>, %arg4: memref<128x128xbf16, #tpu.memory_space<vmem>>, %arg5: memref<1x128xf32, #tpu.memory_space<vmem>>, %arg6: memref<16x128xf32, #tpu.memory_space<vmem>>, %arg7: memref<16x128xf32, #tpu.memory_space<vmem>>) attributes {dimension_semantics = [#tpu.dimension_semantics<parallel>], iteration_bounds = array<i64: 2>, scalar_prefetch = 0 : i64, scratch_operands = 0 : i64, tpu.core_type = #tpu.core_type<tc>, window_params = [{transform_indices = @transform_0, window_bounds = array<i64: 16, 128>}, {pipeline_mode = #tpu.pipeline_mode<synchronous>, transform_indices = @transform_1, window_bounds = array<i64: 128, 128>}, {pipeline_mode = #tpu.pipeline_mode<synchronous>, transform_indices = @transform_2, window_bounds = array<i64: 1, 128>}, {pipeline_mode = #tpu.pipeline_mode<synchronous>, transform_indices = @transform_3, window_bounds = array<i64: 128, 128>}, {pipeline_mode = #tpu.pipeline_mode<synchronous>, transform_indices = @transform_4, window_bounds = array<i64: 1, 128>}, {transform_indices = @transform_5, window_bounds = array<i64: 16, 128>}, {transform_indices = @transform_6, window_bounds = array<i64: 16, 128>}]} {
    %c0 = arith.constant 0 : index
    %c0_0 = arith.constant 0 : index
    %0 = vector.load %arg1[%c0, %c0_0] : memref<16x128xbf16, #tpu.memory_space<vmem>>, vector<16x128xbf16>
    %c0_1 = arith.constant 0 : index
    %c0_2 = arith.constant 0 : index
    %1 = vector.load %arg2[%c0_1, %c0_2] : memref<128x128xbf16, #tpu.memory_space<vmem>>, vector<128x128xbf16>
    %cst = arith.constant dense<0.000000e+00> : vector<16x128xf32>
    %2 = tpu.matmul %0, %1, %cst {dimension_numbers = #tpu.dot_dimension_numbers<[1], [0], [0], [1], [0, 0, 1, 1], [], []>} : vector<16x128xbf16>, vector<128x128xbf16>, vector<16x128xf32> -> vector<16x128xf32>
    %c0_3 = arith.constant 0 : index
    %c0_4 = arith.constant 0 : index
    %3 = vector.load %arg3[%c0_3, %c0_4] : memref<1x128xf32, #tpu.memory_space<vmem>>, vector<1x128xf32>
    %4 = vector.broadcast %3 : vector<1x128xf32> to vector<16x128xf32>
    %5 = arith.addf %2, %4 : vector<16x128xf32>
    %cst_5 = arith.constant 0.000000e+00 : f32
    %6 = vector.broadcast %cst_5 : f32 to vector<16x128xf32>
    %7 = arith.maximumf %5, %6 : vector<16x128xf32>
    %c0_6 = arith.constant 0 : index
    %c0_7 = arith.constant 0 : index
    %8 = vector.load %arg6[%c0_6, %c0_7] : memref<16x128xf32, #tpu.memory_space<vmem>>, vector<16x128xf32>
    tpu.vector_store %arg6[%c0_6, %c0_7], %7 {strides = array<i32>} : memref<16x128xf32, #tpu.memory_space<vmem>>, vector<16x128xf32>,
    %9 = arith.truncf %7 : vector<16x128xf32> to vector<16x128xbf16>
    %c0_8 = arith.constant 0 : index
    %c0_9 = arith.constant 0 : index
    %10 = vector.load %arg4[%c0_8, %c0_9] : memref<128x128xbf16, #tpu.memory_space<vmem>>, vector<128x128xbf16>
    %cst_10 = arith.constant dense<0.000000e+00> : vector<16x128xf32>
    %11 = tpu.matmul %9, %10, %cst_10 {dimension_numbers = #tpu.dot_dimension_numbers<[1], [0], [0], [1], [0, 0, 1, 1], [], []>} : vector<16x128xbf16>, vector<128x128xbf16>, vector<16x128xf32> -> vector<16x128xf32>
    %c0_11 = arith.constant 0 : index
    %c0_12 = arith.constant 0 : index
    %12 = vector.load %arg5[%c0_11, %c0_12] : memref<1x128xf32, #tpu.memory_space<vmem>>, vector<1x128xf32>
    %13 = vector.broadcast %12 : vector<1x128xf32> to vector<16x128xf32>
    %14 = arith.addf %11, %13 : vector<16x128xf32>
    %c0_13 = arith.constant 0 : index
    %c0_14 = arith.constant 0 : index
    %15 = vector.load %arg7[%c0_13, %c0_14] : memref<16x128xf32, #tpu.memory_space<vmem>>, vector<16x128xf32>
    tpu.vector_store %arg7[%c0_13, %c0_14], %14 {strides = array<i32>} : memref<16x128xf32, #tpu.memory_space<vmem>>, vector<16x128xf32>,
    return
  }
  func.func @transform_0(%arg0: i32) -> (i32, i32) {
    %c0_i32 = arith.constant 0 : i32
    %c0_i32_0 = arith.constant 0 : i32
    return %arg0, %c0_i32 : i32, i32
  }
  func.func @transform_1(%arg0: i32) -> (i32, i32) {
    %c0_i32 = arith.constant 0 : i32
    %c0_i32_0 = arith.constant 0 : i32
    %c0_i32_1 = arith.constant 0 : i32
    return %c0_i32, %c0_i32_0 : i32, i32
  }
  func.func @transform_2(%arg0: i32) -> (i32, i32) {
    %c0_i32 = arith.constant 0 : i32
    %c0_i32_0 = arith.constant 0 : i32
    %c0_i32_1 = arith.constant 0 : i32
    return %c0_i32, %c0_i32_0 : i32, i32
  }
  func.func @transform_3(%arg0: i32) -> (i32, i32) {
    %c0_i32 = arith.constant 0 : i32
    %c0_i32_0 = arith.constant 0 : i32
    %c0_i32_1 = arith.constant 0 : i32
    return %c0_i32, %c0_i32_0 : i32, i32
  }
  func.func @transform_4(%arg0: i32) -> (i32, i32) {
    %c0_i32 = arith.constant 0 : i32
    %c0_i32_0 = arith.constant 0 : i32
    %c0_i32_1 = arith.constant 0 : i32
    return %c0_i32, %c0_i32_0 : i32, i32
  }
  func.func @transform_5(%arg0: i32) -> (i32, i32) {
    %c0_i32 = arith.constant 0 : i32
    %c0_i32_0 = arith.constant 0 : i32
    return %arg0, %c0_i32 : i32, i32
  }
  func.func @transform_6(%arg0: i32) -> (i32, i32) {
    %c0_i32 = arith.constant 0 : i32
    %c0_i32_0 = arith.constant 0 : i32
    return %arg0, %c0_i32 : i32, i32
  }
}

</mosaic_0001>

<bundles_post_ra>
// kernel: tpu_custom_call.1
= control target key start
LH: loop header
LB: loop body
LE: loop exit
PB: predicated region body
PF: predicated region fallthrough
CT: control target
= control target key end

     0   :  { %12 = vsyncpa [#allocation3], 0  ;;  %s1384_s0 = inlined_call_operand.hbm [shape: bf16[32,128], index: 0, kind: input, shape index: {}]   ;;  %s1385_s1 = inlined_call_operand.hbm [shape: bf16[128,128], index: 1, kind: input, shape index: {}]   ;;  %s1386_s2 = inlined_call_operand.vmem [shape: f32[1,128], index: 2, kind: input, shape index: {}]   ;;  %s1387_s3 = inlined_call_operand.hbm [shape: bf16[128,128], index: 3, kind: input, shape index: {}]   ;;  %s1388_s4 = inlined_call_operand.vmem [shape: f32[1,128], index: 4, kind: input, shape index: {}]   ;;  %s1389_s5 = inlined_call_operand.hbm [shape: f32[32,128], index: 5, kind: output, shape index: {0}]   ;;  %s1390_s6 = inlined_call_operand.hbm [shape: f32[32,128], index: 6, kind: output, shape index: {1}]  }
   0x1   :  { %14 = vsyncpa [#allocation3 + $0x1], 0 }
   0x2   :  { %15 = vsyncpa [#allocation6], 0 }
   0x3   :  { %16 = vsyncpa [#allocation4], 0 }
   0x4   :  { %18 = vsyncpa [#allocation4 + $0x1], 0 }
   0x5   :  { %19 = vsyncpa [#allocation10], 0 }
   0x6   :  { %21 = vsyncpa [#allocation10 + $0x1], 0  ;;  %s1135_s21 = smov 0   ;;  %s1137_s22 = smov 0  }
   0x7   :  { %s1139_s23 = smov 0   ;;  %s1141_s24 = smov 0  }
   0x8 LB: > { %s1156_s25 = sadd.s32 4294967295, %s1087_s24   ;;  %s712_s26 = sadd.s32 4294967294, %s1087_s24   ;;  %s1087_s24 = sphi %s1141_s24, %s1415_s24   ;;  %s1083_s23 = sphi %s1139_s23, %s1414_s23   ;;  %s1079_s22 = sphi %s1137_s22, %s1413_s22   ;;  %s1075_s21 = sphi %s1135_s21, %s1412_s21  }
   0x9   : > { %p47_p0 = scmp.ne.s32.totalorder %s1079_s22, %s1075_s21  ;;  %p1391_p1 = scmp.eq.s32.totalorder %s1156_s25, 0 }
   0xa   : > { %p155_p2 = scmp.eq.s32.totalorder %s1156_s25, 1  ;;  %p161_p3 = scmp.eq.s32.totalorder %s712_s26, 1 }
   0xb   : > { %p1165_p4 = por %p1391_p1, %p47_p0  ;;  %p713_p5 = scmp.ge.s32.totalorder %s1087_s24, 1 }
   0xc   : > { %p1170_p6 = por %p161_p3, %p47_p0  ;;  %p194_p7 = scmp.lt.s32.totalorder %s1087_s24, 3 }
   0xd   : > { %s1397_s27 = scalar_select %p1165_p4, 1, 0 }
   0xe   : > { %s1398_s28 = scalar_select %p1170_p6, 1, 0 }
   0xf   : > { %p1175_p8 = pnand %p713_p5, %p194_p7  ;;  %s1089_s30 = smov [#allocation5]  }
  0x10   : > { %s206_s7 = sshll.u32 %s1089_s30, 4  ;;  %s1090_s9 = smov [#allocation7]   ;;  %s207_s7 = int_to_ptr.vmem [resolvable:$true] %s206_s7 }
  0x11   : > { %s1399_s29 = scalar_select %p1175_p8, 1, 0 }
  0x12   : > { %p828_p9 = pneg %p1175_p8  ;;  %s222_s10 = sshll.u32 %s1090_s9, 4  ;;  %s223_s10 = int_to_ptr.vmem [resolvable:$true] %s222_s10 }
  0x13   : > { %s920_s11 = scalar_lea.vmem %s207_s7, 1024  ;;  %p928_p5 = scmp.lt.s32.totalorder %s207_s7, %s207_s7 }
  0x14   : > { %p1184_p11 = pnand %p828_p9, %p1391_p1  ;;  %p921_p13 = scmp.ne.s32.totalorder %s207_s7, %s920_s11 }
  0x15   : > { %p929_p7 = scmp.lt.s32.totalorder %s920_s11, %s920_s11 }
  0x16   : > { %p911_p12 = pneg %p1184_p11 }
  0x17   : > { %p930_p10 = por %p929_p7, %p928_p5 }
  0x18   : > { %p923_p0 = pnand %p921_p13, %p911_p12 }
  0x1a   : > { %p924_p3 = pneg %p923_p0 }
  0x1c   : > { %p931_p9 = pnand %p930_p10, %p924_p3 }
  0x1e   : > { %934 = shalt.err (!%p931_p9)
}
  0x1f   : > { %s1392_s12 = smov 64   ;;  %s1393_s13 = smov 4  }
  0x20   : > { %831 = dma.hbm_to_vmem [thread:$0]  (!%p1184_p11), %s1385_s1, 1024, %s207_s7, [#allocation6], %s1392_s12, %s1392_s12, %s1393_s13  }
  0x21   : > { %s946_s16 = scalar_lea.vmem %s223_s10, 1024  ;;  %p954_p10 = scmp.lt.s32.totalorder %s223_s10, %s223_s10 }
  0x22   : > { %p947_p13 = scmp.ne.s32.totalorder %s223_s10, %s946_s16  ;;  %p955_p3 = scmp.lt.s32.totalorder %s946_s16, %s946_s16 }
  0x24   : > { %p949_p0 = pnand %p947_p13, %p911_p12  ;;  %p956_p7 = por %p955_p3, %p954_p10 }
  0x26   : > { %p950_p5 = pneg %p949_p0 }
  0x28   : > { %p957_p9 = pnand %p956_p7, %p950_p5 }
  0x2a   : > { %960 = shalt.err (!%p957_p9)
}
  0x2b   : > { %834 = dma.hbm_to_vmem [thread:$0]  (!%p1184_p11), %s1387_s3, 1024, %s223_s10, [#allocation6], %s1392_s12, %s1392_s12, %s1393_s13  }
  0x2c   : > { %s1213_s19 = sadd.s32 1, %s1087_s24   ;;  %s34_s20 = sadd.s32 1, %s1083_s23 }
  0x2d   : > { %s31_s26 = ssub.s32 %s1087_s24, %s1213_s19  ;;  %p41_p12 = scmp.ne.s32.totalorder %s1083_s23, %s1079_s22 }
  0x2e   : > { %p32_p13 = scmp.eq.s32.totalorder %s31_s26, 0  ;;  %p42_p0 = scmp.eq.s32.totalorder %s1087_s24, 0 }
  0x2f   : > { %p1223_p5 = por %p155_p2, %p41_p12  ;;  %p848_p10 = scmp.lt.s32.totalorder %s1087_s24, 2 }
  0x30   : > { %s1229_s7 = scalar_select %p32_p13, %s1083_s23, %s34_s20  }
  0x31   : > { %s1401_s30 = scalar_select %p1223_p5, 1, 0 }
  0x32   : > { %p43_p3 = por %p42_p0, %p41_p12  ;;  %s239_s8 = sand.u32 1, %s1083_s23  }
  0x33   : > { %s717_s9 = sshll.u32 %s239_s8, 3  ;;  %s753_s10 = sshll.u32 %s1087_s24, 7 }
  0x34   : > { %s1236_s15 = scalar_lea.hbm %s1384_s0, %s753_s10  ;;  %s243_s16 = scalar_lea.vmem [#allocation2], %s717_s9 }
  0x35   : > { %s250_s17 = sshll.u32 %s243_s16, 4  ;;  %p1240_p2 = pnand %p848_p10, %p43_p3  ;;  %s1238_s17 = int_to_ptr.vmem [resolvable:$true] %s250_s17 }
  0x36   : > { %s1244_s20 = scalar_lea.sflag [#allocation3], %s239_s8  ;;  %s961_s26 = scalar_lea.hbm %s1236_s15, 128 }
  0x37   : > { %p962_p11 = scmp.ne.s32.totalorder %s1236_s15, %s961_s26  ;;  %p963_p7 = pneg %p1240_p2 }
  0x38   : > { %s966_s9 = scalar_lea.hbm %s1384_s0, 256  ;;  %p967_p13 = scmp.lt.s32.totalorder %s1236_s15, %s1384_s0 }
  0x39   : > { %p964_p9 = pnand %p963_p7, %p962_p11  ;;  %p968_p0 = scmp.lt.s32.totalorder %s966_s9, %s961_s26 }
  0x3b   : > { %p965_p12 = pneg %p964_p9  ;;  %p969_p10 = por %p968_p0, %p967_p13 }
  0x3d   : > { %p970_p3 = pnand %p969_p10, %p965_p12 }
  0x3f   : > { %973 = shalt.err (!%p970_p3)
}
  0x40   : > { %s974_s8 = scalar_lea.vmem %s1238_s17, 128  ;;  %s1093_s12 = smov [#allocation2]  }
  0x41   : > { %p975_p1 = scmp.ne.s32.totalorder %s1238_s17, %s974_s8  ;;  %s979_s13 = sshll.u32 %s1093_s12, 4  ;;  %s980_s13 = int_to_ptr.vmem [resolvable:$false] %s979_s13 }
  0x42   : > { %s981_s10 = scalar_lea.vmem %s980_s13, 256  ;;  %p982_p9 = scmp.lt.s32.totalorder %s1238_s17, %s980_s13 }
  0x43   : > { %p977_p6 = pnand %p975_p1, %p963_p7  ;;  %p983_p5 = scmp.lt.s32.totalorder %s981_s10, %s974_s8 }
  0x45   : > { %p978_p11 = pneg %p977_p6  ;;  %p984_p4 = por %p983_p5, %p982_p9 }
  0x47   : > { %p985_p8 = pnand %p984_p4, %p978_p11 }
  0x49   : > { %988 = shalt.err (!%p985_p8)
}
  0x4a   : > { %s1403_s26 = smov 4   ;;  %s1404_s11 = smov 64  }
  0x4b   : > { %838 = dma.hbm_to_vmem [thread:$0]  (!%p1240_p2), %s1236_s15, 128, %s1238_s17, %s1244_s20, %s1404_s11, %s1404_s11, %s1403_s26  }
  0x4c   : > { %p1405_p1 = scmp.ne.s32.totalorder %s1399_s29, 0 }
  0x4d   : > { %s1271_s12 = sand.u32 (!%p1405_p1), 1, %s1079_s22   ;;  %p1406_p4 = scmp.ne.s32.totalorder (!%p1405_p1), %s1397_s27, 0 }
  0x4e   : > { %262 = sbr.rel (%p1405_p1) target bundleno = 536 (0x218), region = 40  ;;  %s721_s13 = sshll.u32 (!%p1405_p1), %s1271_s12, 3 }
  0x4f   : > { %s265_s9 = scalar_lea.sflag (!%p1405_p1), [#allocation3], %s1271_s12  ;;  %s1275_s14 = scalar_lea.vmem (!%p1405_p1), [#allocation2], %s721_s13 }
  0x53   : > { %1058 = dma.done.wait (%p1406_p4), %s265_s9, 128  }
  0x54   : > { %1060 = vsyncadd (%p1406_p4), %s265_s9, 4294967168  ;;  %p1407_p6 = scmp.eq.s32.totalorder %s1156_s25, 0 }
  0x56   : > { %1062 = dma.done.wait (%p1407_p6), [#allocation6], 2048   ;;  %p1408_p8 = pmov %p1407_p6 }
  0x57   : > { %v1094_v0 = vmov 0.0   ;;  %vm1095_vm0 = vmmov 0   ;;  %v892_v1 = vld [vmem:[#allocation5 + $0x38] sm:$0xff]   ;;  %v893_v2 = vld [vmem:[#allocation5 + $0x30] sm:$0xff]   ;;  %v894_v3 = vld [vmem:[#allocation5 + $0x28] sm:$0xff]   ;;  %s724_s15 = sshll.u32 %s1271_s12, 4 }
  0x58   : > { %1064 = vsyncadd (%p1408_p8), [#allocation6], 4294965248  ;;  %774 = vmatprep.subr.bf16.mxu0 %v1094_v0  ;;  %790 = vmatprep.mubr.msk.bf16.mxu0 %vm1095_vm0, %v1094_v0  ;;  %v901_v4 = vld [vmem:[#allocation7 + $0x38] sm:$0xff]   ;;  %v895_v5 = vld [vmem:[#allocation5 + $0x20] sm:$0xff]   ;;  %s302_s17 = scalar_lea.vmem [#allocation8], %s724_s15  ;;  %s754_s20 = sshll.u32 %s1156_s25, 8 }
  0x59   : > { %794 = vmatprep.subr.bf16.mxu1 %v1094_v0  ;;  %810 = vmatprep.mubr.msk.bf16.mxu1 %vm1095_vm0, %v1094_v0  ;;  %v902_v6 = vld [vmem:[#allocation7 + $0x30] sm:$0xff]   ;;  %v896_v7 = vld [vmem:[#allocation5 + $0x18] sm:$0xff]   ;;  %v903_v8 = vld [vmem:[#allocation7 + $0x28] sm:$0xff]   ;;  %s572_s18 = sshll.u32 %s302_s17, 4  ;;  %s1300_s10 = scalar_lea.hbm %s1389_s5, %s754_s20  ;;  %s1292_s18 = int_to_ptr.vmem [resolvable:$true] %s572_s18 }
  0x5a   : > { %775 = vmatpush3.bf16.msra.mxu0 %v892_v1  ;;  %795 = vmatpush3.bf16.msra.mxu1 %v901_v4  ;;  %v897_v9 = vld [vmem:[#allocation5 + $0x10] sm:$0xff]   ;;  %v904_v10 = vld [vmem:[#allocation7 + $0x20] sm:$0xff]   ;;  %v898_v11 = vld [vmem:[#allocation5 + $0x8] sm:$0xff]   ;;  %s554_s26 = scalar_lea.sflag [#allocation4], %s1271_s12  ;;  %s989_s11 = scalar_lea.vmem %s1292_s18, 256 }
  0x5b   : > { %776 = vmatprep.subr.bf16.mxu0 %v1094_v0  ;;  %796 = vmatprep.subr.bf16.mxu1 %v1094_v0  ;;  %v905_v12 = vld [vmem:[#allocation7 + $0x18] sm:$0xff]   ;;  %v899_v13 = vld [vmem:[#allocation5] sm:$0xff]   ;;  %v906_v15 = vld [vmem:[#allocation7 + $0x10] sm:$0xff]   ;;  %p990_p5 = scmp.ne.s32.totalorder %s1292_s18, %s989_s11  ;;  %p1409_p2 = scmp.ne.s32.totalorder %s1401_s30, 0 }
  0x5c   : > { %v900_v14 = vld [vmem:[%s1275_s14] sm:$0xff]   ;;  %v907_v16 = vld [vmem:[#allocation7 + $0x8] sm:$0xff]   ;;  %v908_v17 = vld [vmem:[#allocation7] sm:$0xff]   ;;  %s1096_s13 = smov [#allocation8]  }
  0x5d   : > { %v726_v18 = vld [vmem:[%s1386_s2] ss:$0 sm:$0xff]  ;;  %p991_p7 = pnand %p990_p5, %p1409_p2  ;;  %s993_s9 = sshll.u32 %s1096_s13, 4  ;;  %s994_s9 = int_to_ptr.vmem [resolvable:$false] %s993_s9 }
  0x5e   : > { %777 = vmatpush3.bf16.msra.mxu0 %v893_v2  ;;  %797 = vmatpush3.bf16.msra.mxu1 %v902_v6  ;;  %s995_s14 = scalar_lea.vmem %s994_s9, 512  ;;  %p996_p13 = scmp.lt.s32.totalorder %s1292_s18, %s994_s9 }
  0x5f   : > { %778 = vmatprep.subr.bf16.mxu0 %v1094_v0  ;;  %798 = vmatprep.subr.bf16.mxu1 %v1094_v0  ;;  %p992_p12 = pneg %p991_p7  ;;  %p997_p0 = scmp.lt.s32.totalorder %s995_s14, %s989_s11 }
  0x61   : > { %p998_p10 = por %p997_p0, %p996_p13 }
  0x62   : > { %779 = vmatpush3.bf16.msra.mxu0 %v894_v3  ;;  %799 = vmatpush3.bf16.msra.mxu1 %v903_v8 }
  0x63   : > { %780 = vmatprep.subr.bf16.mxu0 %v1094_v0  ;;  %800 = vmatprep.subr.bf16.mxu1 %v1094_v0  ;;  %p999_p3 = pnand %p998_p10, %p992_p12 }
  0x66   : > { %781 = vmatpush3.bf16.msra.mxu0 %v895_v5  ;;  %801 = vmatpush3.bf16.msra.mxu1 %v904_v10 }
  0x67   : > { %782 = vmatprep.subr.bf16.mxu0 %v1094_v0  ;;  %802 = vmatprep.subr.bf16.mxu1 %v1094_v0 }
  0x6a   : > { %783 = vmatpush3.bf16.msra.mxu0 %v896_v7  ;;  %803 = vmatpush3.bf16.msra.mxu1 %v905_v12 }
  0x6b   : > { %784 = vmatprep.subr.bf16.mxu0 %v1094_v0  ;;  %804 = vmatprep.subr.bf16.mxu1 %v1094_v0 }
  0x6e   : > { %785 = vmatpush3.bf16.msra.mxu0 %v897_v9  ;;  %805 = vmatpush3.bf16.msra.mxu1 %v906_v15 }
  0x6f   : > { %786 = vmatprep.subr.bf16.mxu0 %v1094_v0  ;;  %806 = vmatprep.subr.bf16.mxu1 %v1094_v0 }
  0x72   : > { %787 = vmatpush3.bf16.msra.mxu0 %v898_v11  ;;  %807 = vmatpush3.bf16.msra.mxu1 %v907_v16 }
  0x73   : > { %788 = vmatprep.subr.bf16.mxu0 %v1094_v0  ;;  %808 = vmatprep.subr.bf16.mxu1 %v1094_v0 }
  0x76   : > { %789 = vmatpush3.bf16.msra.mxu0 %v899_v13  ;;  %809 = vmatpush3.bf16.msra.mxu1 %v908_v17 }
  0x79   : > { %791 = vmatmul.mubr.bf16.vlgmr.msra.gmra.mxu0 %v900_v14 }
 0x139   : > { %v427_v19 = vpop.f32.mrf.mxu0 }
 0x13a   : > { %v428_v20 = vadd.f32 %v726_v18, %v427_v19 }
 0x13b   : > { %v792_v21 = vpop.f32.mrf.mxu0 }
 0x13c   : > { %v434_v22 = vmax.f32 %v428_v20, 0.0 }
 0x13d   : > { %v430_v23 = vpop.f32.mrf.mxu0 }
 0x13e   : > { %436 = vst [vmem:[%s302_s17] sm:$0xff] %v434_v22  ;;  %v431_v24 = vadd.f32 %v726_v18, %v430_v23 }
 0x13f   : > { %v793_v25 = vpop.f32.mrf.mxu0 }
 0x140   : > { %v435_v26 = vmax.f32 %v431_v24, 0.0 }
 0x142   : > { %437 = vst [vmem:[%s302_s17 + $0x8] sm:$0xff] %v435_v26  ;;  %v438_v27 = vpack.c.bf16 %v435_v26, %v434_v22 }
 0x144   : > { %811 = vmatmul.mubr.bf16.vlgmr.msra.gmra.mxu1 %v438_v27 }
 0x145   : > { %1002 = shalt.err (!%p999_p3)
}
 0x146   : > { %s1003_s27 = scalar_lea.hbm %s1300_s10, 256  ;;  %s1007_s16 = scalar_lea.hbm %s1389_s5, 512 }
 0x147   : > { %p1004_p11 = scmp.ne.s32.totalorder %s1300_s10, %s1003_s27  ;;  %p1008_p4 = scmp.lt.s32.totalorder %s1300_s10, %s1389_s5 }
 0x148   : > { %p1009_p6 = scmp.lt.s32.totalorder %s1007_s16, %s1003_s27 }
 0x149   : > { %p1005_p9 = pnand %p1004_p11, %p1409_p2 }
 0x14a   : > { %p1010_p8 = por %p1009_p6, %p1008_p4 }
 0x14b   : > { %p1006_p1 = pneg %p1005_p9 }
 0x14d   : > { %p1011_p5 = pnand %p1010_p8, %p1006_p1 }
 0x14f   : > { %1014 = shalt.err (!%p1011_p5)
}
 0x150   : > { %s1097_s11 = smov 128   ;;  %s1098_s9 = smov 8   ;;  %v736_v28 = vld [vmem:[%s1388_s4] ss:$0 sm:$0xff] }
 0x151   : > { %824 = dma.vmem_to_hbm [thread:$0]  (%p1409_p2), %s1292_s18, 256, %s1300_s10, %s554_s26, %s1097_s11, %s1097_s11, %s1098_s9  }
 0x152   : > { %s309_s29 = scalar_lea.vmem [#allocation9], %s724_s15  ;;  %s1340_s26 = scalar_lea.hbm %s1390_s6, %s754_s20 }
 0x153   : > { %s588_s17 = sshll.u32 %s309_s29, 4  ;;  %s559_s16 = scalar_lea.sflag [#allocation10], %s1271_s12  ;;  %s1333_s17 = int_to_ptr.vmem [resolvable:$true] %s588_s17 }
 0x154   : > { %s1015_s15 = scalar_lea.vmem %s1333_s17, 256  ;;  %s1099_s8 = smov [#allocation9]  }
 0x155   : > { %p1016_p7 = scmp.ne.s32.totalorder %s1333_s17, %s1015_s15  ;;  %s1019_s13 = sshll.u32 %s1099_s8, 4  ;;  %s1020_s13 = int_to_ptr.vmem [resolvable:$false] %s1019_s13 }
 0x156   : > { %s1021_s14 = scalar_lea.vmem %s1020_s13, 512  ;;  %p1022_p0 = scmp.lt.s32.totalorder %s1333_s17, %s1020_s13 }
 0x157   : > { %p1017_p12 = pnand %p1016_p7, %p1409_p2  ;;  %p1023_p10 = scmp.lt.s32.totalorder %s1021_s14, %s1015_s15 }
 0x159   : > { %p1018_p13 = pneg %p1017_p12  ;;  %p1024_p3 = por %p1023_p10, %p1022_p0 }
 0x15b   : > { %p1025_p11 = pnand %p1024_p3, %p1018_p13 }
 0x204   : > { %v544_v29 = vpop.f32.mrf.mxu1 }
 0x205   : > { %v545_v30 = vadd.f32 %v736_v28, %v544_v29 }
 0x206   : > { %v812_v31 = vpop.f32.mrf.mxu1 }
 0x207   : > { %551 = vst [vmem:[%s309_s29] sm:$0xff] %v545_v30 }
 0x208   : > { %v547_v32 = vpop.f32.mrf.mxu1 }
 0x209   : > { %v548_v33 = vadd.f32 %v736_v28, %v547_v32 }
 0x20a   : > { %v813_v34 = vpop.f32.mrf.mxu1 }
 0x20b   : > { %552 = vst [vmem:[%s309_s29 + $0x8] sm:$0xff] %v548_v33 }
 0x20c   : > { %1028 = shalt.err (!%p1025_p11)
}
 0x20d   : > { %s1029_s25 = scalar_lea.hbm %s1340_s26, 256  ;;  %s1033_s27 = scalar_lea.hbm %s1390_s6, 512 }
 0x20e   : > { %p1030_p9 = scmp.ne.s32.totalorder %s1340_s26, %s1029_s25  ;;  %p1034_p6 = scmp.lt.s32.totalorder %s1340_s26, %s1390_s6 }
 0x20f   : > { %p1035_p8 = scmp.lt.s32.totalorder %s1033_s27, %s1029_s25 }
 0x210   : > { %p1031_p1 = pnand %p1030_p9, %p1409_p2 }
 0x211   : > { %p1036_p5 = por %p1035_p8, %p1034_p6 }
 0x212   : > { %p1032_p4 = pneg %p1031_p1 }
 0x214   : > { %p1037_p7 = pnand %p1036_p5, %p1032_p4 }
 0x216   : > { %1040 = shalt.err (!%p1037_p7)
}
 0x217   : > { %825 = dma.vmem_to_hbm [thread:$0]  (%p1409_p2), %s1333_s17, 256, %s1340_s26, %s559_s16, %s1097_s11, %s1097_s11, %s1098_s9  }
 0x218 PF: > { %s603_s10 = sand.u32 1, %s1075_s21   ;;  %p1410_p12 = scmp.ne.s32.totalorder %s1398_s28, 0 }
 0x219   : > { %p1411_p13 = scmp.ge.s32.totalorder %s1087_s24, 2  ;;  %s604_s15 = scalar_lea.sflag [#allocation4], %s603_s10 }
 0x21b   : > { %p840_p0 = pnand %p1411_p13, %p1410_p12 }
 0x21d   : > { %p841_p10 = pneg %p840_p0 }
 0x21f   : > { %1066 = dma.done.wait (%p841_p10), %s604_s15, 256  }
 0x220   : > { %1068 = vsyncadd (%p841_p10), %s604_s15, 4294967040  ;;  %s613_s8 = scalar_lea.sflag [#allocation10], %s603_s10 }
 0x221   : > { %1070 = dma.done.wait (%p841_p10), %s613_s8, 256  }
 0x222   : > { %1072 = vsyncadd (%p841_p10), %s613_s8, 4294967040  ;;  %p24_p2 = scmp.ge.s32.totalorder %s1213_s19, 4   ;;  %s1412_s21 = smov %s1079_s22 }
 0x223   : > { %s1413_s22 = smov %s1083_s23  ;;  %s1414_s23 = smov %s1229_s7 }
 0x224   : > { %s1415_s24 = smov %s1213_s19  ;;  %26 = sbr.rel (!%p24_p2) target bundleno = 8 (0x8), region = 110 }
 0x229   :  { %618 = vsyncpa [#allocation3], 1 }
 0x22a   :  { %620 = vsyncpa [#allocation3 + $0x1], 1 }
 0x22b   :  { %621 = vsyncpa [#allocation6], 1 }
 0x22c   :  { %622 = vsyncpa [#allocation4], 1 }
 0x22d   :  { %624 = vsyncpa [#allocation4 + $0x1], 1 }
 0x22e   :  { %625 = vsyncpa [#allocation10], 1 }
 0x22f   :  { %627 = vsyncpa [#allocation10 + $0x1], 1 }

</bundles_post_ra>
